<compile_context>
chip_gen: v7x
topology: tpu7x:2x2x1
jax: 0.10.0
libtpu: 0.0.40
codegen_flags: <defaults>
</compile_context>

<pallas_src>
import functools

import jax
import jax.numpy as jnp
import numpy as np
from jax.experimental import pallas as pl
from jax.experimental.pallas import tpu as pltpu


def _up_conv_kernel(xs_ref, w_ref, bias_ref, o_ref, *, W_S, M):
    # xs_ref:   (1, Cin_p, (TL+3)*W_S) bf16  flattened padded low-res strip (+halo)
    # w_ref:    (16*Cout, 9*Cin_p)     bf16  phase-aggregated weights, BN scale folded
    # bias_ref: (16*Cout, 1)           f32   conv bias + BN shift (tiled per phase)
    # o_ref:    (1, 16*Cout, M)        bf16  16 phase slabs, M = TL*W_S
    # im2col over the 9 low-res taps (a, b): static shifted views of the flat slab.
    slabs = [xs_ref[0, :, pl.ds(a * W_S + b, M)]
             for a in range(3) for b in range(3)]
    patch = jnp.concatenate(slabs, axis=0)                        # (9*Cin_p, M) bf16
    # Single fused MXU matmul over all 16 phases (f32 accumulation).
    acc = jnp.dot(w_ref[...], patch,
                  preferred_element_type=jnp.float32)             # (16*Cout, M) f32
    # Epilogue: bias (conv bias + BN shift) + ReLU, bf16 store.
    o_ref[0] = jnp.maximum(acc + bias_ref[...], 0.0).astype(o_ref.dtype)


def _vmem_need(t, W_S, cin_p, cout):
    """Rough per-step VMEM working set in bytes for strip rows `t`."""
    M = t * W_S
    LS = (t + 3) * W_S
    return (2 * cin_p * LS * 2            # double-buffered bf16 input block
            + 2 * 16 * cout * M * 2       # double-buffered bf16 output block
            + 16 * cout * 9 * cin_p * 2   # resident bf16 weights
            + 9 * cin_p * M * 2           # im2col patch (bf16)
            + 16 * cout * M * 4           # f32 matmul accumulator
            + 16 * cout * M * 2)          # bf16 epilogue temp


def _pick_strip_rows(H, W, cin_p, cout, budget_bytes):
    """Largest divisor of H whose working set fits the VMEM budget."""
    W_S = W + 2
    for t in range(H, 0, -1):
        if H % t == 0 and _vmem_need(t, W_S, cin_p, cout) <= budget_bytes:
            return t
    # TODO(synk): also tile W for extreme (Cin, W) combinations.
    return 1


@jax.jit
def up_conv_forward(x_nchw, weight, bias, gamma, beta, run_mean, run_var, eps=1e-5):
    """x_nchw: (N, Cin, H, W) f32. Returns (N, Cout, 4H, 4W) f32."""
    N, Cin, H, W = x_nchw.shape
    Cout = weight.shape[0]
    Ho, Wo = 4 * H, 4 * W

    # Pad Cin to a sublane multiple so the im2col concat stays aligned.
    Cin_p = ((Cin + 7) // 8) * 8

    # Per-generation VMEM budget / limit (v7x: 64 MiB per TC, v6e/v5e: 128 MiB).
    try:
        vmem_cap = int(pltpu.get_tpu_info().vmem_capacity_bytes)
    except Exception:                      # conservative fallback = v7x per-TC VMEM
        vmem_cap = 64 * 1024 * 1024
    budget = max(8 << 20, vmem_cap // 2 - (4 << 20))

    TL = _pick_strip_rows(H, W, Cin_p, Cout, budget)   # low-res rows per strip
    n_strips = H // TL
    W_S = W + 2                      # padded low-res row stride (1-px halo each side)
    M = TL * W_S                     # flattened spatial extent of one strip phase
    LS = (TL + 3) * W_S              # slab length (halo + 1 spare row for tap overrun)
    G = N * n_strips                 # flattened parallel grid (balanced megacore split)

    need = _vmem_need(TL, W_S, Cin_p, Cout)
    vmem_limit = int(max(32 << 20, min(vmem_cap * 3 // 4, need + (16 << 20))))

    # Low-res input: pad by the conv halo (padding the LOW-RES image reproduces the
    # 1-px zero pad of the upsampled image under the phase mapping), zero-pad the
    # channels to Cin_p, cut into row strips and flatten the spatial dims.
    xpl = jnp.pad(x_nchw, ((0, 0), (0, Cin_p - Cin), (1, 2), (1, 1)))
    xpl = xpl.astype(jnp.bfloat16)                                  # (N, Cin_p, H+3, W_S)
    if n_strips == 1:
        xs = xpl.reshape(G, Cin_p, LS)                              # no extra input copy
    else:
        # TODO(synk): replace with a manual-DMA overlapping-window read (pl.ANY).
        xs = jnp.stack([xpl[:, :, r * TL:r * TL + TL + 3, :]
                        for r in range(n_strips)], axis=1)          # (N, ns, Cin_p, TL+3, W_S)
        xs = xs.reshape(G, Cin_p, LS)

    # Per-phase aggregated weights: tap (dy,dx) of phase (py,px) lands on low-res
    # offset (a,b) = ((py+dy-1)//4 + 1, (px+dx-1)//4 + 1).
    rmap = np.zeros((4, 3, 3), np.float32)
    cmap = np.zeros((4, 3, 3), np.float32)
    for p in range(4):
        for d in range(3):
            rmap[p, d, (p + d - 1) // 4 + 1] = 1.0
            cmap[p, d, (p + d - 1) // 4 + 1] = 1.0
    w_pad = jnp.pad(weight, ((0, 0), (0, Cin_p - Cin), (0, 0), (0, 0)))
    w6 = jnp.einsum('yda,xeb,oide->yxoabi',
                    jnp.asarray(rmap), jnp.asarray(cmap), w_pad)    # (4,4,Cout,3,3,Cin_p)

    # Fold inference-BN scale into the weights (f32, before bf16 cast) and fold
    # conv bias + BN shift into one per-channel f32 bias (tiled over the 16 phases).
    scale = gamma / jnp.sqrt(run_var + eps)                         # (Cout,)
    w6 = w6 * scale[None, None, :, None, None, None]
    w_eff = w6.reshape(16 * Cout, 9 * Cin_p).astype(jnp.bfloat16)
    b_eff = (bias - run_mean) * scale + beta                        # (Cout,)
    bias2 = jnp.tile(b_eff, 16).reshape(16 * Cout, 1).astype(jnp.float32)

    kernel = functools.partial(_up_conv_kernel, W_S=W_S, M=M)

    out_ph = pl.pallas_call(
        kernel,
        out_shape=jax.ShapeDtypeStruct((G, 16 * Cout, M), jnp.bfloat16),
        grid=(G,),
        in_specs=[
            pl.BlockSpec((1, Cin_p, LS), lambda g: (g, 0, 0)),
            pl.BlockSpec((16 * Cout, 9 * Cin_p), lambda g: (0, 0)),
            pl.BlockSpec((16 * Cout, 1), lambda g: (0, 0)),
        ],
        out_specs=pl.BlockSpec((1, 16 * Cout, M), lambda g: (g, 0, 0)),
        compiler_params=pltpu.CompilerParams(
            dimension_semantics=("parallel",),
            vmem_limit_bytes=vmem_limit),
    )(xs, w_eff, bias2)

    # De-interleave phases back into NCHW and upcast to f32
    # (one fused XLA slice+transpose+convert pass over the bf16 kernel output).
    o = out_ph.reshape(N, n_strips, 4, 4, Cout, TL, W_S)[..., :W]
    o = o.astype(jnp.float32)
    o = jnp.transpose(o, (0, 4, 1, 5, 2, 6, 3))      # (N, Cout, ns, TL, py, W, px)
    return o.reshape(N, Cout, Ho, Wo)


def _reference(x_nchw, weight, bias, gamma, beta, run_mean, run_var, eps=1e-5):
    xu = jnp.repeat(jnp.repeat(x_nchw, 4, axis=2), 4, axis=3)
    y = jax.lax.conv_general_dilated(
        xu, weight, window_strides=(1, 1), padding=((1, 1), (1, 1)),
        dimension_numbers=("NCHW", "OIHW", "NCHW"))
    y = y + bias.reshape(1, -1, 1, 1)
    y = gamma.reshape(1, -1, 1, 1) * (y - run_mean.reshape(1, -1, 1, 1)) \
        / jnp.sqrt(run_var.reshape(1, -1, 1, 1) + eps) + beta.reshape(1, -1, 1, 1)
    return jnp.maximum(y, 0.0)


if __name__ == "__main__":
    key = jax.random.PRNGKey(0)
    k_x, k_w, k_b, k_g, k_be, k_m, k_v = jax.random.split(key, 7)

    N, C_in, C_out, H, W = 2, 4, 8, 16, 16

    x = jax.random.normal(k_x, (N, C_in, H, W), dtype=jnp.float32)
    weight = 0.1 * jax.random.normal(k_w, (C_out, C_in, 3, 3), dtype=jnp.float32)
    bias = 0.1 * jax.random.normal(k_b, (C_out,), dtype=jnp.float32)
    gamma = 1.0 + 0.1 * jax.random.normal(k_g, (C_out,), dtype=jnp.float32)
    beta = 0.1 * jax.random.normal(k_be, (C_out,), dtype=jnp.float32)
    run_mean = 0.1 * jax.random.normal(k_m, (C_out,), dtype=jnp.float32)
    run_var = 0.5 + jnp.abs(jax.random.normal(k_v, (C_out,), dtype=jnp.float32))

    out = up_conv_forward(x, weight, bias, gamma, beta, run_mean, run_var)
    out = jax.block_until_ready(out)

    ref = _reference(x, weight, bias, gamma, beta, run_mean, run_var)
    assert out.shape == (N, C_out, 4 * H, 4 * W), out.shape
    # Kernel uses bf16 weights/activations (BN scale folded into the bf16 weights)
    # with f32 accumulation and a bf16 output store, so compare against the f32
    # reference with a bf16-appropriate tolerance.
    assert jnp.allclose(out, ref, rtol=2e-2, atol=3e-2), \
        float(jnp.max(jnp.abs(out - ref)))

    print("KERNEL_OK")
</pallas_src>

<mosaic_0001>
module attributes {stable_mosaic.version = 11 : i64} {
  func.func @_up_conv_kernel(%arg0: i32, %arg1: memref<1x8x342xbf16, #tpu.memory_space<vmem>>, %arg2: memref<128x72xbf16, #tpu.memory_space<vmem>>, %arg3: memref<128x1xf32, #tpu.memory_space<vmem>>, %arg4: memref<1x128x288xbf16, #tpu.memory_space<vmem>>) attributes {dimension_semantics = [#tpu.dimension_semantics<parallel>], iteration_bounds = array<i64: 2>, scalar_prefetch = 0 : i64, scratch_operands = 0 : i64, tpu.core_type = #tpu.core_type<tc>, window_params = [{transform_indices = @transform_0, window_bounds = array<i64: 1, 8, 342>}, {pipeline_mode = #tpu.pipeline_mode<synchronous>, transform_indices = @transform_1, window_bounds = array<i64: 128, 72>}, {pipeline_mode = #tpu.pipeline_mode<synchronous>, transform_indices = @transform_2, window_bounds = array<i64: 128, 1>}, {transform_indices = @transform_3, window_bounds = array<i64: 1, 128, 288>}]} {
    %c0 = arith.constant 0 : index
    %c0_0 = arith.constant 0 : index
    %c0_1 = arith.constant 0 : index
    %0 = vector.load %arg1[%c0, %c0_0, %c0_1] : memref<1x8x342xbf16, #tpu.memory_space<vmem>>, vector<1x8x288xbf16>
    %1 = vector.shape_cast %0 : vector<1x8x288xbf16> to vector<8x288xbf16>
    %c0_2 = arith.constant 0 : index
    %c0_3 = arith.constant 0 : index
    %c1 = arith.constant 1 : index
    %2 = vector.load %arg1[%c0_2, %c0_3, %c1] : memref<1x8x342xbf16, #tpu.memory_space<vmem>>, vector<1x8x288xbf16>
    %3 = vector.shape_cast %2 : vector<1x8x288xbf16> to vector<8x288xbf16>
    %c0_4 = arith.constant 0 : index
    %c0_5 = arith.constant 0 : index
    %c2 = arith.constant 2 : index
    %4 = vector.load %arg1[%c0_4, %c0_5, %c2] : memref<1x8x342xbf16, #tpu.memory_space<vmem>>, vector<1x8x288xbf16>
    %5 = vector.shape_cast %4 : vector<1x8x288xbf16> to vector<8x288xbf16>
    %c0_6 = arith.constant 0 : index
    %c0_7 = arith.constant 0 : index
    %c18 = arith.constant 18 : index
    %6 = vector.load %arg1[%c0_6, %c0_7, %c18] : memref<1x8x342xbf16, #tpu.memory_space<vmem>>, vector<1x8x288xbf16>
    %7 = vector.shape_cast %6 : vector<1x8x288xbf16> to vector<8x288xbf16>
    %c0_8 = arith.constant 0 : index
    %c0_9 = arith.constant 0 : index
    %c19 = arith.constant 19 : index
    %8 = vector.load %arg1[%c0_8, %c0_9, %c19] : memref<1x8x342xbf16, #tpu.memory_space<vmem>>, vector<1x8x288xbf16>
    %9 = vector.shape_cast %8 : vector<1x8x288xbf16> to vector<8x288xbf16>
    %c0_10 = arith.constant 0 : index
    %c0_11 = arith.constant 0 : index
    %c20 = arith.constant 20 : index
    %10 = vector.load %arg1[%c0_10, %c0_11, %c20] : memref<1x8x342xbf16, #tpu.memory_space<vmem>>, vector<1x8x288xbf16>
    %11 = vector.shape_cast %10 : vector<1x8x288xbf16> to vector<8x288xbf16>
    %c0_12 = arith.constant 0 : index
    %c0_13 = arith.constant 0 : index
    %c36 = arith.constant 36 : index
    %12 = vector.load %arg1[%c0_12, %c0_13, %c36] : memref<1x8x342xbf16, #tpu.memory_space<vmem>>, vector<1x8x288xbf16>
    %13 = vector.shape_cast %12 : vector<1x8x288xbf16> to vector<8x288xbf16>
    %c0_14 = arith.constant 0 : index
    %c0_15 = arith.constant 0 : index
    %c37 = arith.constant 37 : index
    %14 = vector.load %arg1[%c0_14, %c0_15, %c37] : memref<1x8x342xbf16, #tpu.memory_space<vmem>>, vector<1x8x288xbf16>
    %15 = vector.shape_cast %14 : vector<1x8x288xbf16> to vector<8x288xbf16>
    %c0_16 = arith.constant 0 : index
    %c0_17 = arith.constant 0 : index
    %c38 = arith.constant 38 : index
    %16 = vector.load %arg1[%c0_16, %c0_17, %c38] : memref<1x8x342xbf16, #tpu.memory_space<vmem>>, vector<1x8x288xbf16>
    %17 = vector.shape_cast %16 : vector<1x8x288xbf16> to vector<8x288xbf16>
    %18 = tpu.concatenate %1, %3, %5, %7, %9, %11, %13, %15, %17 in 0 : vector<8x288xbf16>, vector<8x288xbf16>, vector<8x288xbf16>, vector<8x288xbf16>, vector<8x288xbf16>, vector<8x288xbf16>, vector<8x288xbf16>, vector<8x288xbf16>, vector<8x288xbf16> -> vector<72x288xbf16>
    %c0_18 = arith.constant 0 : index
    %c0_19 = arith.constant 0 : index
    %19 = vector.load %arg2[%c0_18, %c0_19] : memref<128x72xbf16, #tpu.memory_space<vmem>>, vector<128x72xbf16>
    %cst = arith.constant dense<0.000000e+00> : vector<128x288xf32>
    %20 = tpu.matmul %19, %18, %cst {dimension_numbers = #tpu.dot_dimension_numbers<[1], [0], [0], [1], [0, 0, 1, 1], [], []>} : vector<128x72xbf16>, vector<72x288xbf16>, vector<128x288xf32> -> vector<128x288xf32>
    %c0_20 = arith.constant 0 : index
    %c0_21 = arith.constant 0 : index
    %21 = vector.load %arg3[%c0_20, %c0_21] : memref<128x1xf32, #tpu.memory_space<vmem>>, vector<128x1xf32>
    %22 = vector.broadcast %21 : vector<128x1xf32> to vector<128x288xf32>
    %23 = arith.addf %20, %22 : vector<128x288xf32>
    %cst_22 = arith.constant 0.000000e+00 : f32
    %24 = vector.broadcast %cst_22 : f32 to vector<128x288xf32>
    %25 = arith.maximumf %23, %24 : vector<128x288xf32>
    %26 = arith.truncf %25 : vector<128x288xf32> to vector<128x288xbf16>
    %c0_23 = arith.constant 0 : index
    %c0_24 = arith.constant 0 : index
    %c0_25 = arith.constant 0 : index
    %27 = vector.load %arg4[%c0_23, %c0_24, %c0_25] : memref<1x128x288xbf16, #tpu.memory_space<vmem>>, vector<1x128x288xbf16>
    %28 = vector.shape_cast %27 : vector<1x128x288xbf16> to vector<128x288xbf16>
    %29 = vector.shape_cast %26 : vector<128x288xbf16> to vector<1x128x288xbf16>
    tpu.vector_store %arg4[%c0_23, %c0_24, %c0_25], %29 {strides = array<i32>} : memref<1x128x288xbf16, #tpu.memory_space<vmem>>, vector<1x128x288xbf16>,
    return
  }
  func.func @transform_0(%arg0: i32) -> (i32, i32, i32) {
    %c0_i32 = arith.constant 0 : i32
    %c0_i32_0 = arith.constant 0 : i32
    %c0_i32_1 = arith.constant 0 : i32
    return %arg0, %c0_i32, %c0_i32_0 : i32, i32, i32
  }
  func.func @transform_1(%arg0: i32) -> (i32, i32) {
    %c0_i32 = arith.constant 0 : i32
    %c0_i32_0 = arith.constant 0 : i32
    %c0_i32_1 = arith.constant 0 : i32
    return %c0_i32, %c0_i32_0 : i32, i32
  }
  func.func @transform_2(%arg0: i32) -> (i32, i32) {
    %c0_i32 = arith.constant 0 : i32
    %c0_i32_0 = arith.constant 0 : i32
    %c0_i32_1 = arith.constant 0 : i32
    return %c0_i32, %c0_i32_0 : i32, i32
  }
  func.func @transform_3(%arg0: i32) -> (i32, i32, i32) {
    %c0_i32 = arith.constant 0 : i32
    %c0_i32_0 = arith.constant 0 : i32
    %c0_i32_1 = arith.constant 0 : i32
    return %arg0, %c0_i32, %c0_i32_0 : i32, i32, i32
  }
}

</mosaic_0001>

<bundles_post_ra>
// kernel: tile.8
= control target key start
LH: loop header
LB: loop body
LE: loop exit
PB: predicated region body
PF: predicated region fallthrough
CT: control target
= control target key end

     0   :  { %s28_s0 = inlined_call_operand.vmem [shape: f32[8], index: 0, kind: input, shape index: {}]   ;;  %s29_s1 = inlined_call_operand.vmem [shape: f32[16,8], index: 1, kind: output, shape index: {}]  }
   0x1   :  { %v4_v0 = vld [vmem:[%s28_s0] ss:$0 sm:$0xff] }
   0x2   :  { %5 = vst [vmem:[%s29_s1] sm:$0xff] %v4_v0  ;;  %8 = vst [vmem:[%s29_s1 + $0x8] sm:$0xff] %v4_v0 }

// kernel: tile.0
= control target key start
LH: loop header
LB: loop body
LE: loop exit
PB: predicated region body
PF: predicated region fallthrough
CT: control target
= control target key end

     0   :  { %vm3_vm0 = vcmask 7168   ;;  %s178_s10 = smov 127   ;;  %s179_s19 = smov 125   ;;  %s328_s0 = inlined_call_operand.vmem [shape: f32[16,8], index: 0, kind: input, shape index: {}]   ;;  %s329_s1 = inlined_call_operand.vmem [shape: f32[128,1], index: 1, kind: output, shape index: {}]  }
   0x1   :  { %v30_v0 = vld [vmem:[%s328_s0] sm:$0xff]   ;;  %v142_v1 = vld [vmem:[%s328_s0 + $0x8] sm:$0xff]   ;;  %s177_s0 = smov 126   ;;  %s180_s20 = smov 124  }
   0x2   :  { %31 = vrot.lane.b32.xlu1 %v30_v0, %s177_s0  ;;  %14 = vrot.lane.b32.xlu0 %v30_v0, %s178_s10  ;;  %4 = vst.msk [vmem:[%s329_s1] ss:$8 sm:$0xf] %vm3_vm0, %v30_v0   ;;  %5 = vst.msk [vmem:[%s329_s1] ss:$8 sm:$0xf0] %vm3_vm0, %v30_v0  }
   0x3   :  { %133 = vst.msk [vmem:[%s329_s1 + $0x40] ss:$8 sm:$0xf] %vm3_vm0, %v142_v1   ;;  %134 = vst.msk [vmem:[%s329_s1 + $0x40] ss:$8 sm:$0xf0] %vm3_vm0, %v142_v1  }
   0x4   :  { %s181_s21 = smov 123   ;;  %s182_s22 = smov 122  }
   0x5   :  { %s183_s23 = smov 121  }
   0x6   :  { %40 = vrot.lane.b32.xlu1 %v142_v1, %s177_s0  ;;  %23 = vrot.lane.b32.xlu0 %v142_v1, %s178_s10 }
   0xa   :  { %57 = vrot.lane.b32.xlu1 %v142_v1, %s179_s19  ;;  %48 = vrot.lane.b32.xlu0 %v30_v0, %s179_s19 }
   0xe   :  { %74 = vrot.lane.b32.xlu1 %v142_v1, %s180_s20  ;;  %65 = vrot.lane.b32.xlu0 %v30_v0, %s180_s20 }
  0x12   :  { %91 = vrot.lane.b32.xlu1 %v142_v1, %s181_s21  ;;  %82 = vrot.lane.b32.xlu0 %v30_v0, %s181_s21 }
  0x16   :  { %108 = vrot.lane.b32.xlu1 %v142_v1, %s182_s22  ;;  %99 = vrot.lane.b32.xlu0 %v30_v0, %s182_s22 }
  0x1a   :  { %125 = vrot.lane.b32.xlu1 %v142_v1, %s183_s23  ;;  %116 = vrot.lane.b32.xlu0 %v30_v0, %s183_s23 }
  0x74   :  { %v32_v2 = vpop.permute.xlu1 %31   ;;  %v15_v3 = vpop.permute.xlu0 %14  }
  0x75   :  { %140 = vst.msk [vmem:[%s329_s1 + $0x2] ss:$8 sm:$0xf] %vm3_vm0, %v32_v2   ;;  %141 = vst.msk [vmem:[%s329_s1 + $0x2] ss:$8 sm:$0xf0] %vm3_vm0, %v32_v2  }
  0x76   :  { %135 = vst.msk [vmem:[%s329_s1 + $0x1] ss:$8 sm:$0xf] %vm3_vm0, %v15_v3   ;;  %136 = vst.msk [vmem:[%s329_s1 + $0x1] ss:$8 sm:$0xf0] %vm3_vm0, %v15_v3  }
  0x78   :  { %v41_v4 = vpop.permute.xlu1 %40   ;;  %v24_v5 = vpop.permute.xlu0 %23  }
  0x79   :  { %143 = vst.msk [vmem:[%s329_s1 + $0x42] ss:$8 sm:$0xf] %vm3_vm0, %v41_v4   ;;  %144 = vst.msk [vmem:[%s329_s1 + $0x42] ss:$8 sm:$0xf0] %vm3_vm0, %v41_v4  }
  0x7a   :  { %138 = vst.msk [vmem:[%s329_s1 + $0x41] ss:$8 sm:$0xf] %vm3_vm0, %v24_v5   ;;  %139 = vst.msk [vmem:[%s329_s1 + $0x41] ss:$8 sm:$0xf0] %vm3_vm0, %v24_v5  }
  0x7c   :  { %v58_v6 = vpop.permute.xlu1 %57   ;;  %v49_v7 = vpop.permute.xlu0 %48  }
  0x7d   :  { %148 = vst.msk [vmem:[%s329_s1 + $0x43] ss:$8 sm:$0xf] %vm3_vm0, %v58_v6   ;;  %149 = vst.msk [vmem:[%s329_s1 + $0x43] ss:$8 sm:$0xf0] %vm3_vm0, %v58_v6  }
  0x7e   :  { %145 = vst.msk [vmem:[%s329_s1 + $0x3] ss:$8 sm:$0xf] %vm3_vm0, %v49_v7   ;;  %146 = vst.msk [vmem:[%s329_s1 + $0x3] ss:$8 sm:$0xf0] %vm3_vm0, %v49_v7  }
  0x80   :  { %v75_v8 = vpop.permute.xlu1 %74   ;;  %v66_v9 = vpop.permute.xlu0 %65  }
  0x81   :  { %153 = vst.msk [vmem:[%s329_s1 + $0x44] ss:$8 sm:$0xf] %vm3_vm0, %v75_v8   ;;  %154 = vst.msk [vmem:[%s329_s1 + $0x44] ss:$8 sm:$0xf0] %vm3_vm0, %v75_v8  }
  0x82   :  { %150 = vst.msk [vmem:[%s329_s1 + $0x4] ss:$8 sm:$0xf] %vm3_vm0, %v66_v9   ;;  %151 = vst.msk [vmem:[%s329_s1 + $0x4] ss:$8 sm:$0xf0] %vm3_vm0, %v66_v9  }
  0x84   :  { %v92_v10 = vpop.permute.xlu1 %91   ;;  %v83_v11 = vpop.permute.xlu0 %82  }
  0x85   :  { %158 = vst.msk [vmem:[%s329_s1 + $0x45] ss:$8 sm:$0xf] %vm3_vm0, %v92_v10   ;;  %159 = vst.msk [vmem:[%s329_s1 + $0x45] ss:$8 sm:$0xf0] %vm3_vm0, %v92_v10  }
  0x86   :  { %155 = vst.msk [vmem:[%s329_s1 + $0x5] ss:$8 sm:$0xf] %vm3_vm0, %v83_v11   ;;  %156 = vst.msk [vmem:[%s329_s1 + $0x5] ss:$8 sm:$0xf0] %vm3_vm0, %v83_v11  }
  0x88   :  { %v109_v12 = vpop.permute.xlu1 %108   ;;  %v100_v13 = vpop.permute.xlu0 %99  }
  0x89   :  { %163 = vst.msk [vmem:[%s329_s1 + $0x46] ss:$8 sm:$0xf] %vm3_vm0, %v109_v12   ;;  %164 = vst.msk [vmem:[%s329_s1 + $0x46] ss:$8 sm:$0xf0] %vm3_vm0, %v109_v12  }
  0x8a   :  { %160 = vst.msk [vmem:[%s329_s1 + $0x6] ss:$8 sm:$0xf] %vm3_vm0, %v100_v13   ;;  %161 = vst.msk [vmem:[%s329_s1 + $0x6] ss:$8 sm:$0xf0] %vm3_vm0, %v100_v13  }
  0x8c   :  { %v126_v14 = vpop.permute.xlu1 %125   ;;  %v117_v15 = vpop.permute.xlu0 %116  }
  0x8d   :  { %168 = vst.msk [vmem:[%s329_s1 + $0x47] ss:$8 sm:$0xf] %vm3_vm0, %v126_v14   ;;  %169 = vst.msk [vmem:[%s329_s1 + $0x47] ss:$8 sm:$0xf0] %vm3_vm0, %v126_v14  }
  0x8e   :  { %165 = vst.msk [vmem:[%s329_s1 + $0x7] ss:$8 sm:$0xf] %vm3_vm0, %v117_v15   ;;  %166 = vst.msk [vmem:[%s329_s1 + $0x7] ss:$8 sm:$0xf0] %vm3_vm0, %v117_v15  }

// kernel: up_conv_forward.1
= control target key start
LH: loop header
LB: loop body
LE: loop exit
PB: predicated region body
PF: predicated region fallthrough
CT: control target
= control target key end

     0   :  { %s1205_s12 = smov 0   ;;  %s1492_s0 = inlined_call_operand.vmem [shape: bf16[2,8,342], index: 0, kind: input, shape index: {}]   ;;  %s1493_s1 = inlined_call_operand.vmem [shape: bf16[128,72], index: 1, kind: input, shape index: {}]   ;;  %s1494_s2 = inlined_call_operand.vmem [shape: f32[128,1], index: 2, kind: input, shape index: {}]   ;;  %s1495_s3 = inlined_call_operand.vmem [shape: bf16[2,128,288], index: 3, kind: output, shape index: {}]  }
   0x1 LB: > { %s995_s13 = sadd.s32 4294967295, %s1174_s12   ;;  %p999_p0 = scmp.ge.s32.totalorder %s1174_s12, 1  ;;  %s1174_s12 = sphi %s1205_s12, %s13_s12  }
   0x2   : > { %p137_p1 = scmp.lt.s32.totalorder %s1174_s12, 3 }
   0x4   : > { %p138_p2 = pnand %p999_p0, %p137_p1 }
   0x5   : > { %p161_p3 = scmp.lt.s32.totalorder (!%p138_p2), %s995_s13, 1  ;;  %s1176_s18 = smov (!%p138_p2), 127   ;;  %v1246_v4 = vld [vmem:[%s1493_s1] sm:$0xff] (!%p138_p2)   ;;  %v1183_v5 = vmov (!%p138_p2), 0   ;;  %vm455_vm0 = vcmask (!%p138_p2), 588800   ;;  %v320_v7 = vld [vmem:[%s1494_s2 + $0x8] sm:$0xff] (!%p138_p2) }
   0x6   : > { %141 = sbr.rel (%p138_p2) target bundleno = 462 (0x1ce), region = 32  ;;  %s1177_s19 = smov (!%p138_p2), 126   ;;  %521 = vmatprep.mubr.bf16.mxu0 (!%p138_p2), %v1183_v5  ;;  %1155 = vset.pattern.permute.xlu0 (!%p138_p2), %v1183_v5  ;;  %v319_v6 = vld [vmem:[%s1494_s2] sm:$0xff] (!%p138_p2)  ;;  %v322_v8 = vld [vmem:[%s1494_s2 + $0x18] sm:$0xff] (!%p138_p2)  ;;  %v321_v9 = vld [vmem:[%s1494_s2 + $0x10] sm:$0xff] (!%p138_p2)  ;;  %vm188_vm1 = vcmask (!%p138_p2), 1039360  }
   0x7   : > { %s1178_s20 = smov (!%p138_p2), 110   ;;  %s1179_s21 = smov (!%p138_p2), 109   ;;  %1119 = vmatprep.mubr.msk.bf16.mxu1 (!%p138_p2), %vm455_vm0, %v1246_v4  ;;  %1156 = vset.pattern.permute.xlu1 (!%p138_p2), %v1183_v5  ;;  %v324_v10 = vld [vmem:[%s1494_s2 + $0x28] sm:$0xff] (!%p138_p2)  ;;  %v323_v11 = vld [vmem:[%s1494_s2 + $0x20] sm:$0xff] (!%p138_p2)  ;;  %v326_v12 = vld [vmem:[%s1494_s2 + $0x38] sm:$0xff] (!%p138_p2)  ;;  %vm254_vm2 = vcmask (!%p138_p2), 1043456  }
   0x8   : > { %s1180_s22 = smov (!%p138_p2), 108   ;;  %s1181_s23 = smov (!%p138_p2), 92   ;;  %v325_v13 = vld [vmem:[%s1494_s2 + $0x30] sm:$0xff] (!%p138_p2)  ;;  %v328_v14 = vld [vmem:[%s1494_s2 + $0x48] sm:$0xff] (!%p138_p2)  ;;  %v327_v15 = vld [vmem:[%s1494_s2 + $0x40] sm:$0xff] (!%p138_p2)  ;;  %vm197_vm3 = vcmask (!%p138_p2), 1031168  }
   0x9   : > { %s1182_s24 = smov (!%p138_p2), 91   ;;  %s1184_s27 = smov (!%p138_p2), 90   ;;  %v330_v16 = vld [vmem:[%s1494_s2 + $0x58] sm:$0xff] (!%p138_p2)  ;;  %v329_v17 = vld [vmem:[%s1494_s2 + $0x50] sm:$0xff] (!%p138_p2)  ;;  %v332_v20 = vld [vmem:[%s1494_s2 + $0x68] sm:$0xff] (!%p138_p2)  ;;  %vm206_vm4 = vcmask (!%p138_p2), 900096  }
   0xa   : > { %v331_v21 = vld [vmem:[%s1494_s2 + $0x60] sm:$0xff] (!%p138_p2)  ;;  %v334_v27 = vld [vmem:[%s1494_s2 + $0x78] sm:$0xff] (!%p138_p2)  ;;  %v333_v29 = vld [vmem:[%s1494_s2 + $0x70] sm:$0xff] (!%p138_p2)  ;;  %vm215_vm5 = vcmask (!%p138_p2), 891904   ;;  %vm224_vm6 = vcmask (!%p138_p2), 883712   ;;  %vm233_vm7 = vcmask (!%p138_p2), 752640  }
   0xb   : > { %vm242_vm8 = vcmask (!%p138_p2), 744448   ;;  %vm251_vm9 = vcmask (!%p138_p2), 736256   ;;  %vm908_vm10 = vcmask (!%p138_p2), 257024  }
   0xd   : > { %s1497_s13 = smov (!%p161_p3, %s995_s13), 1 }
   0xe   : > { %s1136_s14 = smul.u32 12, %s1497_s13 }
  0x10   : > { %s165_s17 = scalar_lea.vmem %s1492_s0, %s1136_s14 }
  0x11   : > { %v172_v0 = vld [vmem:[%s165_s17] sm:$0xff]  ;;  %v1225_v3 = vld [vmem:[%s165_s17 + $0x8] ss:$0 sps:$4 sm:$0xff]  }
  0x12   : > { %v1219_v1 = vcombine.high %v172_v0, %v172_v0  ;;  %v1221_v2 = vcombine.low %v172_v0, %v172_v0 }
  0x14   : > { %184 = vrot.lane.b32.xlu0 %v1219_v1, %s1176_s18  ;;  %182 = vrot.lane.b32.xlu1 %v1221_v2, %s1176_s18 }
  0x18   : > { %186 = vrot.lane.b32.xlu0 %v1225_v3, %s1176_s18  ;;  %193 = vrot.lane.b32.xlu1 %v1219_v1, %s1177_s19 }
  0x1c   : > { %195 = vrot.lane.b32.xlu0 %v1225_v3, %s1177_s19  ;;  %202 = vrot.lane.b32.xlu1 %v1219_v1, %s1178_s20 }
  0x20   : > { %204 = vrot.lane.b32.xlu0 %v1225_v3, %s1178_s20  ;;  %191 = vrot.lane.b32.xlu1 %v1221_v2, %s1177_s19 }
  0x24   : > { %200 = vrot.lane.b32.xlu0 %v1221_v2, %s1178_s20  ;;  %211 = vrot.lane.b32.xlu1 %v1219_v1, %s1179_s21 }
  0x28   : > { %213 = vrot.lane.b32.xlu0 %v1225_v3, %s1179_s21  ;;  %220 = vrot.lane.b32.xlu1 %v1219_v1, %s1180_s22 }
  0x2c   : > { %222 = vrot.lane.b32.xlu0 %v1225_v3, %s1180_s22  ;;  %209 = vrot.lane.b32.xlu1 %v1221_v2, %s1179_s21 }
  0x30   : > { %218 = vrot.lane.b32.xlu0 %v1221_v2, %s1180_s22  ;;  %229 = vrot.lane.b32.xlu1 %v1219_v1, %s1181_s23 }
  0x34   : > { %231 = vrot.lane.b32.xlu0 %v1225_v3, %s1181_s23  ;;  %238 = vrot.lane.b32.xlu1 %v1219_v1, %s1182_s24 }
  0x38   : > { %240 = vrot.lane.b32.xlu0 %v1225_v3, %s1182_s24  ;;  %227 = vrot.lane.b32.xlu1 %v1221_v2, %s1181_s23 }
  0x3c   : > { %236 = vrot.lane.b32.xlu0 %v1221_v2, %s1182_s24  ;;  %245 = vrot.lane.b32.xlu1 %v1221_v2, %s1184_s27  ;;  %s1137_s24 = smul.u32 192, %s1497_s13 }
  0x3e   : > { %s1389_s26 = scalar_lea.vmem %s1495_s3, %s1137_s24 }
  0x40   : > { %247 = vrot.lane.b32.xlu0 %v1219_v1, %s1184_s27  ;;  %249 = vrot.lane.b32.xlu1 %v1225_v3, %s1184_s27 }
  0x44   : > { %337 = vperm.xlu0 %1155, %v319_v6   ;;  %342 = vperm.xlu1 %1156, %v320_v7  }
  0x48   : > { %352 = vperm.xlu0 %1155, %v322_v8   ;;  %347 = vperm.xlu1 %1156, %v321_v9  }
  0x4c   : > { %362 = vperm.xlu0 %1155, %v324_v10   ;;  %357 = vperm.xlu1 %1156, %v323_v11  }
  0x50   : > { %372 = vperm.xlu0 %1155, %v326_v12   ;;  %367 = vperm.xlu1 %1156, %v325_v13   ;;  %v1161_v13 = vld [vmem:[%s1493_s1 + $0x8] sm:$0xff]  }
  0x54   : > { %382 = vperm.xlu0 %1155, %v328_v14   ;;  %377 = vperm.xlu1 %1156, %v327_v15   ;;  %v1162_v15 = vld [vmem:[%s1493_s1 + $0x10] sm:$0xff]  }
  0x58   : > { %392 = vperm.xlu0 %1155, %v330_v16   ;;  %387 = vperm.xlu1 %1156, %v329_v17   ;;  %v1163_v16 = vld [vmem:[%s1493_s1 + $0x18] sm:$0xff]   ;;  %v1164_v17 = vld [vmem:[%s1493_s1 + $0x20] sm:$0xff]  }
  0x5c   : > { %402 = vperm.xlu0 %1155, %v332_v20   ;;  %397 = vperm.xlu1 %1156, %v331_v21  }
  0x60   : > { %412 = vperm.xlu0 %1155, %v334_v27   ;;  %407 = vperm.xlu1 %1156, %v333_v29  }
  0x86   : > { %v185_v18 = vpop.permute.xlu0 %184  ;;  %v183_v19 = vpop.permute.xlu1 %182 }
  0x87   : > { %v189_v22 = vsel %vm188_vm1, %v183_v19, %v185_v18  ;;  %v1167_v19 = vld [vmem:[%s1493_s1 + $0x38] sm:$0xff]  }
  0x88   : > { %v257_v30 = vsel %vm254_vm2, %v1221_v2, %v189_v22 }
  0x8a   : > { %v187_v23 = vpop.permute.xlu0 %186  ;;  %v194_v24 = vpop.permute.xlu1 %193 }
  0x8b   : > { %v190_v25 = vsel %vm188_vm1, %v185_v18, %v187_v23  ;;  %v265_v26 = vsel %vm254_vm2, %v1225_v3, %v187_v23  ;;  %v1166_v18 = vld [vmem:[%s1493_s1 + $0x30] sm:$0xff]  }
  0x8c   : > { %1109 = vmatprep.subr.bf16.mxu1 %v265_v26  ;;  %v261_v28 = vsel %vm254_vm2, %v1219_v1, %v190_v25 }
  0x8d   : > { %489 = vmatprep.subr.bf16.mxu0 %v261_v28  ;;  %1110 = vmatpush3.bf16.msra.mxu1 %v265_v26 }
  0x8e   : > { %v196_v31 = vpop.permute.xlu0 %195  ;;  %490 = vmatpush1.bf16.msra.mxu0 %v257_v30  ;;  %v203_v32 = vpop.permute.xlu1 %202 }
  0x8f   : > { %v199_v35 = vsel %vm197_vm3, %v194_v24, %v196_v31 }
  0x92   : > { %v205_v33 = vpop.permute.xlu0 %204  ;;  %v192_v34 = vpop.permute.xlu1 %191 }
  0x93   : > { %v208_v36 = vsel %vm206_vm4, %v203_v32, %v205_v33  ;;  %v277_v37 = vsel %vm254_vm2, %v196_v31, %v205_v33  ;;  %v198_v41 = vsel %vm197_vm3, %v192_v34, %v194_v24 }
  0x94   : > { %1111 = vmatprep.subr.bf16.mxu1 %v277_v37  ;;  %v273_v38 = vsel %vm254_vm2, %v199_v35, %v208_v36 }
  0x95   : > { %491 = vmatprep.subr.bf16.mxu0 %v273_v38  ;;  %1112 = vmatpush3.bf16.msra.mxu1 %v277_v37 }
  0x96   : > { %v201_v39 = vpop.permute.xlu0 %200  ;;  %v212_v40 = vpop.permute.xlu1 %211 }
  0x97   : > { %v207_v42 = vsel %vm206_vm4, %v201_v39, %v203_v32 }
  0x98   : > { %v269_v43 = vsel %vm254_vm2, %v198_v41, %v207_v42 }
  0x99   : > { %492 = vmatpush1.bf16.msra.mxu0 %v269_v43 }
  0x9a   : > { %v214_v44 = vpop.permute.xlu0 %213  ;;  %v221_v45 = vpop.permute.xlu1 %220 }
  0x9b   : > { %v217_v48 = vsel %vm215_vm5, %v212_v40, %v214_v44 }
  0x9e   : > { %v223_v46 = vpop.permute.xlu0 %222  ;;  %v210_v47 = vpop.permute.xlu1 %209 }
  0x9f   : > { %v226_v49 = vsel %vm224_vm6, %v221_v45, %v223_v46  ;;  %v289_v50 = vsel %vm254_vm2, %v214_v44, %v223_v46  ;;  %v216_v54 = vsel %vm215_vm5, %v210_v47, %v212_v40 }
  0xa0   : > { %1113 = vmatprep.subr.bf16.mxu1 %v289_v50  ;;  %v285_v51 = vsel %vm254_vm2, %v217_v48, %v226_v49 }
  0xa1   : > { %493 = vmatprep.subr.bf16.mxu0 %v285_v51  ;;  %1114 = vmatpush3.bf16.msra.mxu1 %v289_v50 }
  0xa2   : > { %v219_v52 = vpop.permute.xlu0 %218  ;;  %v230_v53 = vpop.permute.xlu1 %229 }
  0xa3   : > { %v225_v55 = vsel %vm224_vm6, %v219_v52, %v221_v45 }
  0xa4   : > { %v281_v56 = vsel %vm254_vm2, %v216_v54, %v225_v55 }
  0xa5   : > { %494 = vmatpush1.bf16.msra.mxu0 %v281_v56 }
  0xa6   : > { %v232_v57 = vpop.permute.xlu0 %231  ;;  %v239_v58 = vpop.permute.xlu1 %238 }
  0xa7   : > { %v235_v61 = vsel %vm233_vm7, %v230_v53, %v232_v57 }
  0xaa   : > { %v241_v59 = vpop.permute.xlu0 %240  ;;  %v228_v60 = vpop.permute.xlu1 %227 }
  0xab   : > { %v244_v62 = vsel %vm242_vm8, %v239_v58, %v241_v59  ;;  %v301_v63 = vsel %vm254_vm2, %v232_v57, %v241_v59  ;;  %v234_v3 = vsel %vm233_vm7, %v228_v60, %v230_v53 }
  0xac   : > { %1115 = vmatprep.subr.bf16.mxu1 %v301_v63  ;;  %v297_v0 = vsel %vm254_vm2, %v235_v61, %v244_v62 }
  0xad   : > { %495 = vmatprep.subr.bf16.mxu0 %v297_v0  ;;  %1116 = vmatpush3.bf16.msra.mxu1 %v301_v63 }
  0xae   : > { %v237_v1 = vpop.permute.xlu0 %236  ;;  %v246_v2 = vpop.permute.xlu1 %245 }
  0xaf   : > { %v243_v6 = vsel %vm242_vm8, %v237_v1, %v239_v58 }
  0xb0   : > { %v293_v7 = vsel %vm254_vm2, %v234_v3, %v243_v6 }
  0xb1   : > { %496 = vmatpush1.bf16.msra.mxu0 %v293_v7 }
  0xb2   : > { %v248_v8 = vpop.permute.xlu0 %247  ;;  %v250_v9 = vpop.permute.xlu1 %249 }
  0xb3   : > { %v252_v10 = vsel %vm251_vm9, %v246_v2, %v248_v8  ;;  %1135 = vmatprep.subr.msk.bf16.mxu1 %vm254_vm2, %v250_v9  ;;  %v253_v11 = vsel %vm251_vm9, %v248_v8, %v250_v9  ;;  %v487_v12 = vsel %vm254_vm2, %v250_v9, 0 }
  0xb4   : > { %1013 = vmatprep.subr.msk.bf16.mxu0 %vm254_vm2, %v253_v11  ;;  %1118 = vmatpush3.bf16.msra.mxu1 %v487_v12  ;;  %v481_v14 = vsel %vm254_vm2, %v252_v10, 0 }
  0xb5   : > { %498 = vmatpush1.bf16.msra.mxu0 %v481_v14 }
  0xb7   : > { %1120 = vmatmul.mubr.msk.bf16.vlgmr.msra.gmra.mrb[0].mxu1 %vm455_vm0, %v1161_v13 }
  0xb8   : > { %1014 = vmatmul.mubr.msk.bf16.vlgmr.msra.gmra.mrb[0].mxu0 %vm455_vm0, %v1246_v4  ;;  %1123 = vmatprep.mubr.msk.bf16.mxu1 %vm455_vm0, %v1162_v15  ;;  %v1165_v4 = vld [vmem:[%s1493_s1 + $0x28] sm:$0xff]  }
  0xb9   : > { %531 = vmatprep.mubr.bf16.mxu0 %v1183_v5 }
  0xbf   : > { %1124 = vmatmul.mubr.msk.bf16.gmra.mrb[4].mxu1 %vm455_vm0, %v1163_v16 }
  0xc0   : > { %1015 = vmatmul.mubr.msk.bf16.gmra.mrb[4].mxu0 %vm455_vm0, %v1161_v13  ;;  %1127 = vmatprep.mubr.msk.bf16.mxu1 %vm455_vm0, %v1164_v17 }
  0xc1   : > { %541 = vmatprep.mubr.bf16.mxu0 %v1183_v5 }
  0xc3   : > { %v343_v20 = vpop.permute.xlu1 %342  ;;  %v338_v21 = vpop.permute.xlu0 %337 }
  0xc7   : > { %1128 = vmatmul.mubr.msk.bf16.gmra.mrb[8].mxu1 %vm455_vm0, %v1165_v4  ;;  %v1370_v22 = vpop.permute.xlu0 %352  ;;  %v348_v23 = vpop.permute.xlu1 %347 }
  0xc8   : > { %1016 = vmatmul.mubr.msk.bf16.gmra.mrb[8].mxu0 %vm455_vm0, %v1162_v15  ;;  %1131 = vmatprep.mubr.msk.bf16.mxu1 %vm455_vm0, %v1166_v18 }
  0xc9   : > { %551 = vmatprep.mubr.bf16.mxu0 %v1183_v5 }
  0xcb   : > { %v1372_v24 = vpop.permute.xlu0 %362  ;;  %v1374_v25 = vpop.permute.xlu1 %357 }
  0xcf   : > { %1132 = vmatmul.mubr.msk.bf16.gmra.mrb[12].mxu1 %vm455_vm0, %v1167_v19  ;;  %v1376_v26 = vpop.permute.xlu0 %372  ;;  %v1378_v27 = vpop.permute.xlu1 %367 }
  0xd0   : > { %1017 = vmatmul.mubr.msk.bf16.gmra.mrb[12].mxu0 %vm455_vm0, %v1163_v16 }
  0xd1   : > { %561 = vmatprep.mubr.bf16.mxu0 %v1183_v5 }
  0xd3   : > { %v1380_v28 = vpop.permute.xlu0 %382 }
  0xd7   : > { %v1393_v57 = vpop.permute.xlu0 %392 }
  0xd8   : > { %1018 = vmatmul.mubr.msk.bf16.gmra.mrb[16].mxu0 %vm455_vm0, %v1164_v17 }
  0xd9   : > { %571 = vmatprep.mubr.bf16.mxu0 %v1183_v5 }
  0xe0   : > { %1019 = vmatmul.mubr.msk.bf16.gmra.mrb[20].mxu0 %vm455_vm0, %v1165_v4 }
  0xe1   : > { %581 = vmatprep.mubr.bf16.mxu0 %v1183_v5 }
  0xe8   : > { %1020 = vmatmul.mubr.msk.bf16.gmra.mrb[24].mxu0 %vm455_vm0, %v1166_v18 }
  0xe9   : > { %591 = vmatprep.mubr.bf16.mxu0 %v1183_v5  ;;  %v1382_v5 = vpop.permute.xlu1 %377 }
  0xed   : > { %v1397_v60 = vpop.permute.xlu1 %387 }
  0xf0   : > { %1021 = vmatmul.mubr.msk.bf16.gmra.mrb[28].mxu0 %vm455_vm0, %v1167_v19 }
 0x18a   : > { %v1121_v29 = vpop.f32.mrb[0].mxu1 }
 0x18b   : > { %v523_v30 = vpop.f32.mrb[0].mxu0  ;;  %v645_v31 = vadd.f32 %v1121_v29, %v348_v23  ;;  %v636_v32 = vpop.f32.mrb[1].mxu1 }
 0x18c   : > { %v524_v33 = vadd.f32 %v523_v30, %v338_v21  ;;  %v525_v34 = vpop.f32.mrb[1].mxu0  ;;  %v637_v35 = vadd.f32 %v636_v32, %v338_v21  ;;  %v1122_v36 = vpop.f32.mrb[2].mxu1 }
 0x18d   : > { %v526_v37 = vadd.f32 %v525_v34, %v338_v21  ;;  %v527_v38 = vpop.f32.mrb[2].mxu0  ;;  %v707_v39 = vmax.f32 %v645_v31, 0.0  ;;  %v648_v40 = vadd.f32 %v1122_v36, %v1370_v22  ;;  %v639_v41 = vpop.f32.mrb[3].mxu1 }
 0x18e   : > { %v699_v42 = vmax.f32 %v524_v33, 0.0  ;;  %v528_v43 = vadd.f32 %v527_v38, %v343_v20  ;;  %v529_v44 = vpop.f32.mrb[3].mxu0  ;;  %v701_v45 = vmax.f32 %v637_v35, 0.0  ;;  %v640_v46 = vadd.f32 %v639_v41, %v343_v20  ;;  %v1413_v32 = vpop.permute.xlu0 %402 }
 0x18f   : > { %v700_v47 = vmax.f32 %v526_v37, 0.0  ;;  %v530_v48 = vadd.f32 %v529_v44, %v343_v20  ;;  %v1069_v49 = vpack.c.bf16 %v707_v39, %v707_v39  ;;  %v710_v50 = vmax.f32 %v648_v40, 0.0 }
 0x190   : > { %v702_v51 = vmax.f32 %v528_v43, 0.0  ;;  %v1065_v52 = vpack.c.bf16 %v701_v45, %v701_v45  ;;  %v704_v53 = vmax.f32 %v640_v46, 0.0 }
 0x191   : > { %v1064_v54 = vpack.c.bf16 %v700_v47, %v699_v42  ;;  %v703_v55 = vmax.f32 %v530_v48, 0.0  ;;  %913 = vst.msk [vmem:[%s1389_s26 + $0x20] sm:$0xf] %vm908_vm10, %v1069_v49  ;;  %v1071_v56 = vpack.c.bf16 %v710_v50, %v710_v50 }
 0x192   : > { %909 = vst.msk [vmem:[%s1389_s26 + $0x8] sm:$0xf] %vm908_vm10, %v1065_v52  ;;  %v1067_v58 = vpack.c.bf16 %v704_v53, %v704_v53  ;;  %v1125_v59 = vpop.f32.mrb[4].mxu1 }
 0x193   : > { %907 = vst [vmem:[%s1389_s26] sm:$0xff] %v1064_v54  ;;  %v1066_v61 = vpack.c.bf16 %v703_v55, %v702_v51  ;;  %v533_v62 = vpop.f32.mrb[4].mxu0  ;;  %915 = vst.msk [vmem:[%s1389_s26 + $0x2c] sm:$0xf] %vm908_vm10, %v1071_v56  ;;  %v661_v63 = vadd.f32 %v1125_v59, %v1378_v27  ;;  %v652_v0 = vpop.f32.mrb[5].mxu1 }
 0x194   : > { %v534_v1 = vadd.f32 %v533_v62, %v348_v23  ;;  %v535_v2 = vpop.f32.mrb[5].mxu0  ;;  %911 = vst.msk [vmem:[%s1389_s26 + $0x14] sm:$0xf] %vm908_vm10, %v1067_v58  ;;  %v653_v3 = vadd.f32 %v652_v0, %v1374_v25  ;;  %v1126_v6 = vpop.f32.mrb[6].mxu1 }
 0x195   : > { %910 = vst [vmem:[%s1389_s26 + $0xc] sm:$0xff] %v1066_v61  ;;  %v536_v7 = vadd.f32 %v535_v2, %v348_v23  ;;  %v537_v8 = vpop.f32.mrb[6].mxu0  ;;  %v719_v9 = vmax.f32 %v661_v63, 0.0  ;;  %v664_v10 = vadd.f32 %v1126_v6, %v1376_v26  ;;  %v655_v11 = vpop.f32.mrb[7].mxu1 }
 0x196   : > { %v705_v12 = vmax.f32 %v534_v1, 0.0  ;;  %v538_v13 = vadd.f32 %v537_v8, %v1370_v22  ;;  %v539_v14 = vpop.f32.mrb[7].mxu0  ;;  %v713_v15 = vmax.f32 %v653_v3, 0.0  ;;  %v656_v16 = vadd.f32 %v655_v11, %v1372_v24 }
 0x197   : > { %v706_v17 = vmax.f32 %v536_v7, 0.0  ;;  %v540_v4 = vadd.f32 %v539_v14, %v1370_v22  ;;  %v1077_v18 = vpack.c.bf16 %v719_v9, %v719_v9  ;;  %v722_v19 = vmax.f32 %v664_v10, 0.0  ;;  %v1417_v22 = vpop.permute.xlu1 %397 }
 0x198   : > { %v708_v20 = vmax.f32 %v538_v13, 0.0  ;;  %v1073_v21 = vpack.c.bf16 %v713_v15, %v713_v15  ;;  %v716_v23 = vmax.f32 %v656_v16, 0.0 }
 0x199   : > { %v1068_v29 = vpack.c.bf16 %v706_v17, %v705_v12  ;;  %v709_v30 = vmax.f32 %v540_v4, 0.0  ;;  %921 = vst.msk [vmem:[%s1389_s26 + $0x50] sm:$0xf] %vm908_vm10, %v1077_v18  ;;  %v1079_v31 = vpack.c.bf16 %v722_v19, %v722_v19 }
 0x19a   : > { %917 = vst.msk [vmem:[%s1389_s26 + $0x38] sm:$0xf] %vm908_vm10, %v1073_v21  ;;  %v1075_v33 = vpack.c.bf16 %v716_v23, %v716_v23  ;;  %v1129_v34 = vpop.f32.mrb[8].mxu1 }
 0x19b   : > { %912 = vst [vmem:[%s1389_s26 + $0x18] sm:$0xff] %v1068_v29  ;;  %v1070_v35 = vpack.c.bf16 %v709_v30, %v708_v20  ;;  %v543_v36 = vpop.f32.mrb[8].mxu0  ;;  %923 = vst.msk [vmem:[%s1389_s26 + $0x5c] sm:$0xf] %vm908_vm10, %v1079_v31  ;;  %v677_v37 = vadd.f32 %v1129_v34, %v1397_v60  ;;  %v668_v38 = vpop.f32.mrb[9].mxu1 }
 0x19c   : > { %v544_v39 = vadd.f32 %v543_v36, %v1374_v25  ;;  %v545_v40 = vpop.f32.mrb[9].mxu0  ;;  %919 = vst.msk [vmem:[%s1389_s26 + $0x44] sm:$0xf] %vm908_vm10, %v1075_v33  ;;  %v669_v41 = vadd.f32 %v668_v38, %v1382_v5  ;;  %v1130_v42 = vpop.f32.mrb[10].mxu1 }
 0x19d   : > { %914 = vst [vmem:[%s1389_s26 + $0x24] sm:$0xff] %v1070_v35  ;;  %v546_v43 = vadd.f32 %v545_v40, %v1374_v25  ;;  %v547_v44 = vpop.f32.mrb[10].mxu0  ;;  %v731_v45 = vmax.f32 %v677_v37, 0.0  ;;  %v680_v46 = vadd.f32 %v1130_v42, %v1393_v57  ;;  %v671_v47 = vpop.f32.mrb[11].mxu1 }
 0x19e   : > { %v711_v48 = vmax.f32 %v544_v39, 0.0  ;;  %v548_v49 = vadd.f32 %v547_v44, %v1372_v24  ;;  %v549_v50 = vpop.f32.mrb[11].mxu0  ;;  %v725_v51 = vmax.f32 %v669_v41, 0.0  ;;  %v672_v52 = vadd.f32 %v671_v47, %v1380_v28  ;;  %v1433_v61 = vpop.permute.xlu1 %407 }
 0x19f   : > { %v712_v53 = vmax.f32 %v546_v43, 0.0  ;;  %v550_v54 = vadd.f32 %v549_v50, %v1372_v24  ;;  %v1085_v55 = vpack.c.bf16 %v731_v45, %v731_v45  ;;  %v734_v25 = vmax.f32 %v680_v46, 0.0  ;;  %v1439_v24 = vpop.permute.xlu0 %412 }
 0x1a0   : > { %v714_v56 = vmax.f32 %v548_v49, 0.0  ;;  %v1081_v58 = vpack.c.bf16 %v725_v51, %v725_v51  ;;  %v728_v59 = vmax.f32 %v672_v52, 0.0 }
 0x1a1   : > { %v1072_v62 = vpack.c.bf16 %v712_v53, %v711_v48  ;;  %v715_v63 = vmax.f32 %v550_v54, 0.0  ;;  %929 = vst.msk [vmem:[%s1389_s26 + $0x80] sm:$0xf] %vm908_vm10, %v1085_v55  ;;  %v1087_v0 = vpack.c.bf16 %v734_v25, %v734_v25 }
 0x1a2   : > { %925 = vst.msk [vmem:[%s1389_s26 + $0x68] sm:$0xf] %vm908_vm10, %v1081_v58  ;;  %v1083_v1 = vpack.c.bf16 %v728_v59, %v728_v59  ;;  %v1133_v2 = vpop.f32.mrb[12].mxu1 }
 0x1a3   : > { %916 = vst [vmem:[%s1389_s26 + $0x30] sm:$0xff] %v1072_v62  ;;  %v1074_v3 = vpack.c.bf16 %v715_v63, %v714_v56  ;;  %v553_v6 = vpop.f32.mrb[12].mxu0  ;;  %931 = vst.msk [vmem:[%s1389_s26 + $0x8c] sm:$0xf] %vm908_vm10, %v1087_v0  ;;  %v684_v7 = vpop.f32.mrb[13].mxu1  ;;  %v693_v8 = vadd.f32 %v1133_v2, %v1433_v61 }
 0x1a4   : > { %v554_v9 = vadd.f32 %v553_v6, %v1378_v27  ;;  %v555_v10 = vpop.f32.mrb[13].mxu0  ;;  %927 = vst.msk [vmem:[%s1389_s26 + $0x74] sm:$0xf] %vm908_vm10, %v1083_v1  ;;  %v685_v11 = vadd.f32 %v684_v7, %v1417_v22  ;;  %v1134_v12 = vpop.f32.mrb[14].mxu1 }
 0x1a5   : > { %918 = vst [vmem:[%s1389_s26 + $0x3c] sm:$0xff] %v1074_v3  ;;  %v556_v13 = vadd.f32 %v555_v10, %v1378_v27  ;;  %v557_v14 = vpop.f32.mrb[14].mxu0  ;;  %v696_v15 = vadd.f32 %v1134_v12, %v1439_v24  ;;  %v687_v16 = vpop.f32.mrb[15].mxu1  ;;  %v743_v17 = vmax.f32 %v693_v8, 0.0 }
 0x1a6   : > { %v717_v4 = vmax.f32 %v554_v9, 0.0  ;;  %v558_v18 = vadd.f32 %v557_v14, %v1376_v26  ;;  %v559_v19 = vpop.f32.mrb[15].mxu0  ;;  %v737_v20 = vmax.f32 %v685_v11, 0.0  ;;  %v688_v21 = vadd.f32 %v687_v16, %v1413_v32 }
 0x1a7   : > { %v718_v23 = vmax.f32 %v556_v13, 0.0  ;;  %v560_v29 = vadd.f32 %v559_v19, %v1376_v26  ;;  %v746_v27 = vmax.f32 %v696_v15, 0.0  ;;  %v1093_v30 = vpack.c.bf16 %v743_v17, %v743_v17 }
 0x1a8   : > { %v720_v31 = vmax.f32 %v558_v18, 0.0  ;;  %v1089_v33 = vpack.c.bf16 %v737_v20, %v737_v20  ;;  %v740_v34 = vmax.f32 %v688_v21, 0.0 }
 0x1a9   : > { %v1076_v35 = vpack.c.bf16 %v718_v23, %v717_v4  ;;  %v721_v36 = vmax.f32 %v560_v29, 0.0  ;;  %v1095_v37 = vpack.c.bf16 %v746_v27, %v746_v27  ;;  %937 = vst.msk [vmem:[%s1389_s26 + $0xb0] sm:$0xf] %vm908_vm10, %v1093_v30 }
 0x1aa   : > { %933 = vst.msk [vmem:[%s1389_s26 + $0x98] sm:$0xf] %vm908_vm10, %v1089_v33  ;;  %v1091_v38 = vpack.c.bf16 %v740_v34, %v740_v34 }
 0x1ab   : > { %920 = vst [vmem:[%s1389_s26 + $0x48] sm:$0xff] %v1076_v35  ;;  %v1078_v39 = vpack.c.bf16 %v721_v36, %v720_v31  ;;  %939 = vst.msk [vmem:[%s1389_s26 + $0xbc] sm:$0xf] %vm908_vm10, %v1095_v37  ;;  %v563_v26 = vpop.f32.mrb[16].mxu0 }
 0x1ac   : > { %935 = vst.msk [vmem:[%s1389_s26 + $0xa4] sm:$0xf] %vm908_vm10, %v1091_v38  ;;  %v564_v40 = vadd.f32 %v563_v26, %v1382_v5  ;;  %v565_v41 = vpop.f32.mrb[17].mxu0 }
 0x1ad   : > { %922 = vst [vmem:[%s1389_s26 + $0x54] sm:$0xff] %v1078_v39  ;;  %v566_v42 = vadd.f32 %v565_v41, %v1382_v5  ;;  %v567_v43 = vpop.f32.mrb[18].mxu0 }
 0x1ae   : > { %v723_v44 = vmax.f32 %v564_v40, 0.0  ;;  %v568_v45 = vadd.f32 %v567_v43, %v1380_v28  ;;  %v569_v46 = vpop.f32.mrb[19].mxu0 }
 0x1af   : > { %v724_v47 = vmax.f32 %v566_v42, 0.0  ;;  %v570_v48 = vadd.f32 %v569_v46, %v1380_v28 }
 0x1b0   : > { %v726_v49 = vmax.f32 %v568_v45, 0.0 }
 0x1b1   : > { %v1080_v50 = vpack.c.bf16 %v724_v47, %v723_v44  ;;  %v727_v51 = vmax.f32 %v570_v48, 0.0 }
 0x1b3   : > { %924 = vst [vmem:[%s1389_s26 + $0x60] sm:$0xff] %v1080_v50  ;;  %v1082_v52 = vpack.c.bf16 %v727_v51, %v726_v49  ;;  %v573_v53 = vpop.f32.mrb[20].mxu0 }
 0x1b4   : > { %v574_v54 = vadd.f32 %v573_v53, %v1397_v60  ;;  %v575_v55 = vpop.f32.mrb[21].mxu0 }
 0x1b5   : > { %926 = vst [vmem:[%s1389_s26 + $0x6c] sm:$0xff] %v1082_v52  ;;  %v576_v5 = vadd.f32 %v575_v55, %v1397_v60  ;;  %v577_v25 = vpop.f32.mrb[22].mxu0 }
 0x1b6   : > { %v729_v56 = vmax.f32 %v574_v54, 0.0  ;;  %v578_v58 = vadd.f32 %v577_v25, %v1393_v57  ;;  %v579_v59 = vpop.f32.mrb[23].mxu0 }
 0x1b7   : > { %v730_v28 = vmax.f32 %v576_v5, 0.0  ;;  %v580_v62 = vadd.f32 %v579_v59, %v1393_v57 }
 0x1b8   : > { %v732_v63 = vmax.f32 %v578_v58, 0.0 }
 0x1b9   : > { %v1084_v0 = vpack.c.bf16 %v730_v28, %v729_v56  ;;  %v733_v1 = vmax.f32 %v580_v62, 0.0 }
 0x1bb   : > { %928 = vst [vmem:[%s1389_s26 + $0x78] sm:$0xff] %v1084_v0  ;;  %v1086_v2 = vpack.c.bf16 %v733_v1, %v732_v63  ;;  %v583_v3 = vpop.f32.mrb[24].mxu0 }
 0x1bc   : > { %v584_v6 = vadd.f32 %v583_v3, %v1417_v22  ;;  %v585_v7 = vpop.f32.mrb[25].mxu0 }
 0x1bd   : > { %930 = vst [vmem:[%s1389_s26 + $0x84] sm:$0xff] %v1086_v2  ;;  %v586_v60 = vadd.f32 %v585_v7, %v1417_v22  ;;  %v587_v8 = vpop.f32.mrb[26].mxu0 }
 0x1be   : > { %v735_v9 = vmax.f32 %v584_v6, 0.0  ;;  %v588_v10 = vadd.f32 %v587_v8, %v1413_v32  ;;  %v589_v11 = vpop.f32.mrb[27].mxu0 }
 0x1bf   : > { %v736_v57 = vmax.f32 %v586_v60, 0.0  ;;  %v590_v12 = vadd.f32 %v589_v11, %v1413_v32 }
 0x1c0   : > { %v738_v13 = vmax.f32 %v588_v10, 0.0 }
 0x1c1   : > { %v1088_v14 = vpack.c.bf16 %v736_v57, %v735_v9  ;;  %v739_v15 = vmax.f32 %v590_v12, 0.0 }
 0x1c3   : > { %932 = vst [vmem:[%s1389_s26 + $0x90] sm:$0xff] %v1088_v14  ;;  %v1090_v16 = vpack.c.bf16 %v739_v15, %v738_v13  ;;  %v593_v17 = vpop.f32.mrb[28].mxu0 }
 0x1c4   : > { %v594_v4 = vadd.f32 %v593_v17, %v1433_v61  ;;  %v595_v18 = vpop.f32.mrb[29].mxu0 }
 0x1c5   : > { %934 = vst [vmem:[%s1389_s26 + $0x9c] sm:$0xff] %v1090_v16  ;;  %v596_v22 = vadd.f32 %v595_v18, %v1433_v61  ;;  %v597_v19 = vpop.f32.mrb[30].mxu0 }
 0x1c6   : > { %v741_v20 = vmax.f32 %v594_v4, 0.0  ;;  %v598_v21 = vadd.f32 %v597_v19, %v1439_v24  ;;  %v599_v23 = vpop.f32.mrb[31].mxu0 }
 0x1c7   : > { %v742_v32 = vmax.f32 %v596_v22, 0.0  ;;  %v600_v29 = vadd.f32 %v599_v23, %v1439_v24 }
 0x1c8   : > { %v744_v27 = vmax.f32 %v598_v21, 0.0 }
 0x1c9   : > { %v1092_v30 = vpack.c.bf16 %v742_v32, %v741_v20  ;;  %v745_v31 = vmax.f32 %v600_v29, 0.0 }
 0x1cb   : > { %936 = vst [vmem:[%s1389_s26 + $0xa8] sm:$0xff] %v1092_v30  ;;  %v1094_v33 = vpack.c.bf16 %v745_v31, %v744_v27 }
 0x1cd   : > { %938 = vst [vmem:[%s1389_s26 + $0xb4] sm:$0xff] %v1094_v33 }
 0x1ce PF: > { %s13_s12 = sadd.s32 1, %s1174_s12  }
 0x1cf   : > { %p10_p4 = scmp.ge.s32.totalorder %s13_s12, 4  }
 0x1d1   :  { %12 = sbr.rel (!%p10_p4) target bundleno = 1 (0x1), region = 62 }

</bundles_post_ra>
